<compile_context>
chip_gen: v6e
topology: v6e:2x2x1
jax: 0.10.0
libtpu: 0.0.40
codegen_flags: <defaults>
</compile_context>

<pallas_src>
import functools

import jax
import jax.numpy as jnp
from jax.experimental import pallas as pl
from jax.experimental.pallas import tpu as pltpu


# ----------------------------------------------------------------------------------------------
# small shared helpers (traced inside kernels)
# ----------------------------------------------------------------------------------------------

def _gelu_tanh(x):
    # tanh-approximate GELU (EUP tanh).
    # TODO(synk): torch.nn.GELU defaults to the exact erf form; the tanh approximation
    # (max abs err ~3e-4) is used because erf is not relied upon in the Mosaic lowering path.
    c = 0.7978845608028654  # sqrt(2/pi)
    return 0.5 * x * (1.0 + jnp.tanh(c * (x + 0.044715 * x * x * x)))


def _layernorm_f32(x2d, g_ref, b_ref, eps):
    # x2d: (M, C) float32; g_ref/b_ref: (1, C) refs. Stats in f32 (lane reduction on XLU).
    mu = jnp.mean(x2d, axis=-1, keepdims=True)
    xc = x2d - mu
    var = jnp.mean(xc * xc, axis=-1, keepdims=True)
    xn = xc * jax.lax.rsqrt(var + eps)
    return xn * g_ref[...].astype(jnp.float32) + b_ref[...].astype(jnp.float32)


def _mha_into_scratch(qp, kp, vp, ctx_ref, *, bb, nq, nk, num_heads, head_dim, cdt):
    """Per-(batch, head) attention with 2-D matmuls on lane slices.

    qp: (bb*nq, C) f32, already scaled; kp/vp: (bb*nk, C) f32.
    Writes the merged-head context (bb*nq, C) into the f32 VMEM scratch ctx_ref.
    NOTE: at tiny head_dim the QK^T / PV contractions underfill the MXU; real models use D>=64.
    """
    for b in range(bb):
        q0, k0 = b * nq, b * nk
        qb = qp[q0:q0 + nq].astype(cdt)
        kb = kp[k0:k0 + nk].astype(cdt)
        vb = vp[k0:k0 + nk].astype(cdt)
        for h in range(num_heads):
            c0 = h * head_dim
            qh = qb[:, c0:c0 + head_dim]
            kh = kb[:, c0:c0 + head_dim]
            vh = vb[:, c0:c0 + head_dim]
            # scores: (nq, nk), f32 accumulation on the MXU.
            s = jax.lax.dot_general(qh, kh, (((1,), (1,)), ((), ())),
                                    preferred_element_type=jnp.float32)
            s = s - jnp.max(s, axis=-1, keepdims=True)
            p = jnp.exp(s)
            p = p * pl.reciprocal(jnp.sum(p, axis=-1, keepdims=True), approx=True)
            ctx_h = jnp.dot(p.astype(cdt), vh, preferred_element_type=jnp.float32)  # (nq, D)
            ctx_ref[q0:q0 + nq, c0:c0 + head_dim] = ctx_h


def _pick_batch_block(batch, n_rows, target_rows=512):
    """Largest divisor of `batch` whose folded row count stays within the row budget."""
    for cand in range(batch, 0, -1):
        if batch % cand == 0 and cand * n_rows <= max(target_rows, n_rows):
            return cand
    return 1


# ----------------------------------------------------------------------------------------------
# Kernel A: depthwise 3x3 conv position embedding + residual (q = q + pos_embed(q)), NHWC tokens
# ----------------------------------------------------------------------------------------------

def _pos_embed_kernel(xp_ref, w_ref, b_ref, o_ref):
    # xp_ref: (H+2, W+2, C) zero-padded input; w_ref: (9, C) taps; b_ref: (1, C); o_ref: (H, W, C)
    H, W, C = o_ref.shape
    center = xp_ref[1:1 + H, 1:1 + W, :].astype(jnp.float32)          # original q (residual path)
    acc = center + b_ref[...].reshape(1, 1, C).astype(jnp.float32)
    for dy in range(3):
        for dx in range(3):
            tap = w_ref[dy * 3 + dx:dy * 3 + dx + 1, :].astype(jnp.float32).reshape(1, 1, C)
            acc = acc + xp_ref[dy:dy + H, dx:dx + W, :].astype(jnp.float32) * tap
    o_ref[...] = acc.astype(o_ref.dtype)


def pos_embed_conv(x_nhwc, w9, bias, *, vmem_limit_bytes=None):
    B, H, W, C = x_nhwc.shape
    xpad = jnp.pad(x_nhwc, ((0, 0), (1, 1), (1, 1), (0, 0)))          # XLA zero-pad (layout plumbing)
    return pl.pallas_call(
        _pos_embed_kernel,
        out_shape=jax.ShapeDtypeStruct((B, H, W, C), x_nhwc.dtype),
        grid=(B,),
        in_specs=[
            pl.BlockSpec((None, H + 2, W + 2, C), lambda b: (b, 0, 0, 0)),
            pl.BlockSpec((9, C), lambda b: (0, 0)),
            pl.BlockSpec((1, C), lambda b: (0, 0)),
        ],
        out_specs=pl.BlockSpec((None, H, W, C), lambda b: (b, 0, 0, 0)),
        compiler_params=pltpu.CompilerParams(
            dimension_semantics=("parallel",),
            vmem_limit_bytes=vmem_limit_bytes),
    )(xpad, w9, bias)


# ----------------------------------------------------------------------------------------------
# Kernel B: x + gamma * proj(SelfAttention(LayerNorm(x)))   (encoder "pre" block, fused qkv)
# ----------------------------------------------------------------------------------------------

def _sa_block_kernel(x_ref, lng_ref, lnb_ref, wqkv_ref, wproj_ref, bproj_ref, gamma_ref,
                     o_ref, ctx_ref, *, num_heads, scale, eps):
    Bb, N, C = x_ref.shape
    D = C // num_heads
    cdt = x_ref.dtype                                  # MXU operand dtype = input dtype (no upcast)

    x2d = x_ref[...].reshape(Bb * N, C)                # fold batch into the matmul M dimension
    xf = x2d.astype(jnp.float32)
    xn = _layernorm_f32(xf, lng_ref, lnb_ref, eps)

    # One fused (Bb*N, C) x (C, 3C) projection, f32 accumulation.
    qkv = jnp.dot(xn.astype(cdt), wqkv_ref[...], preferred_element_type=jnp.float32)
    qp = qkv[:, :C] * scale
    kp = qkv[:, C:2 * C]
    vp = qkv[:, 2 * C:]

    _mha_into_scratch(qp, kp, vp, ctx_ref, bb=Bb, nq=N, nk=N,
                      num_heads=num_heads, head_dim=D, cdt=cdt)

    out = jnp.dot(ctx_ref[...].astype(cdt), wproj_ref[...], preferred_element_type=jnp.float32)
    out = out + bproj_ref[...].astype(jnp.float32)
    y = xf + gamma_ref[...].astype(jnp.float32) * out
    o_ref[...] = y.reshape(Bb, N, C).astype(o_ref.dtype)


def sa_block(x, ln_g, ln_b, w_qkv, w_proj, b_proj, gamma, *, num_heads, eps=1e-5,
             vmem_limit_bytes=None):
    B, N, C = x.shape
    assert C % num_heads == 0, "dim must be divisible by num_heads"
    scale = (C // num_heads) ** -0.5
    Bb = _pick_batch_block(B, N)
    tok_spec = pl.BlockSpec((Bb, N, C), lambda i: (i, 0, 0))
    cvec = pl.BlockSpec((1, C), lambda i: (0, 0))
    return pl.pallas_call(
        functools.partial(_sa_block_kernel, num_heads=num_heads, scale=scale, eps=eps),
        out_shape=jax.ShapeDtypeStruct((B, N, C), x.dtype),
        grid=(B // Bb,),
        in_specs=[tok_spec, cvec, cvec,
                  pl.BlockSpec((C, 3 * C), lambda i: (0, 0)),
                  pl.BlockSpec((C, C), lambda i: (0, 0)),
                  cvec, cvec],
        out_specs=tok_spec,
        scratch_shapes=[pltpu.VMEM((Bb * N, C), jnp.float32)],
        compiler_params=pltpu.CompilerParams(
            dimension_semantics=("parallel",),
            vmem_limit_bytes=vmem_limit_bytes),
    )(x, ln_g, ln_b, w_qkv, w_proj, b_proj, gamma)


# ----------------------------------------------------------------------------------------------
# Kernel C: x + gamma * MLP(LayerNorm(x))   (used for both mlp_pre and mlp)
# ----------------------------------------------------------------------------------------------

def _mlp_block_kernel(x_ref, lng_ref, lnb_ref, w1_ref, b1_ref, w2_ref, b2_ref, gamma_ref,
                      o_ref, *, eps):
    Bb, N, C = x_ref.shape
    cdt = x_ref.dtype

    x2d = x_ref[...].reshape(Bb * N, C)
    xf = x2d.astype(jnp.float32)
    xn = _layernorm_f32(xf, lng_ref, lnb_ref, eps)

    h = jnp.dot(xn.astype(cdt), w1_ref[...], preferred_element_type=jnp.float32)
    h = h + b1_ref[...].astype(jnp.float32)
    h = _gelu_tanh(h)
    out = jnp.dot(h.astype(cdt), w2_ref[...], preferred_element_type=jnp.float32)
    out = out + b2_ref[...].astype(jnp.float32)
    y = xf + gamma_ref[...].astype(jnp.float32) * out
    o_ref[...] = y.reshape(Bb, N, C).astype(o_ref.dtype)


def mlp_block(x, ln_g, ln_b, w1, b1, w2, b2, gamma, *, eps=1e-5, vmem_limit_bytes=None):
    B, N, C = x.shape
    Hd = w1.shape[1]
    Bb = _pick_batch_block(B, N)
    tok_spec = pl.BlockSpec((Bb, N, C), lambda i: (i, 0, 0))
    cvec = pl.BlockSpec((1, C), lambda i: (0, 0))
    return pl.pallas_call(
        functools.partial(_mlp_block_kernel, eps=eps),
        out_shape=jax.ShapeDtypeStruct((B, N, C), x.dtype),
        grid=(B // Bb,),
        in_specs=[tok_spec, cvec, cvec,
                  pl.BlockSpec((C, Hd), lambda i: (0, 0)),
                  pl.BlockSpec((1, Hd), lambda i: (0, 0)),
                  pl.BlockSpec((Hd, C), lambda i: (0, 0)),
                  cvec, cvec],
        out_specs=tok_spec,
        compiler_params=pltpu.CompilerParams(
            dimension_semantics=("parallel",),
            vmem_limit_bytes=vmem_limit_bytes),
    )(x, ln_g, ln_b, w1, b1, w2, b2, gamma)


# ----------------------------------------------------------------------------------------------
# Kernel D: q + gamma * proj(QKVAttention(LN(q), LN(k), LN(v)))   (decoder cross attention)
# ----------------------------------------------------------------------------------------------

def _cross_attn_block_kernel(q_ref, k_ref, v_ref, lng_ref, lnb_ref,
                             wq_ref, wk_ref, wv_ref, wproj_ref, bproj_ref, gamma_ref,
                             o_ref, ctx_ref, *, num_heads, scale, eps):
    Bb, Nq, C = q_ref.shape
    Nk = k_ref.shape[1]
    D = C // num_heads
    cdt = q_ref.dtype

    qf = q_ref[...].reshape(Bb * Nq, C).astype(jnp.float32)
    kf = k_ref[...].reshape(Bb * Nk, C).astype(jnp.float32)
    vf = v_ref[...].reshape(Bb * Nk, C).astype(jnp.float32)

    # Same LayerNorm parameters applied to q, k and v (matches the module).
    qn = _layernorm_f32(qf, lng_ref, lnb_ref, eps).astype(cdt)
    kn = _layernorm_f32(kf, lng_ref, lnb_ref, eps).astype(cdt)
    vn = _layernorm_f32(vf, lng_ref, lnb_ref, eps).astype(cdt)

    qp = jnp.dot(qn, wq_ref[...], preferred_element_type=jnp.float32) * scale
    kp = jnp.dot(kn, wk_ref[...], preferred_element_type=jnp.float32)
    vp = jnp.dot(vn, wv_ref[...], preferred_element_type=jnp.float32)

    _mha_into_scratch(qp, kp, vp, ctx_ref, bb=Bb, nq=Nq, nk=Nk,
                      num_heads=num_heads, head_dim=D, cdt=cdt)

    out = jnp.dot(ctx_ref[...].astype(cdt), wproj_ref[...], preferred_element_type=jnp.float32)
    out = out + bproj_ref[...].astype(jnp.float32)
    y = qf + gamma_ref[...].astype(jnp.float32) * out
    o_ref[...] = y.reshape(Bb, Nq, C).astype(o_ref.dtype)


def qkv_cross_attn_block(q, k, v, ln_g, ln_b, wq, wk, wv, w_proj, b_proj, gamma,
                         *, num_heads, eps=1e-5, vmem_limit_bytes=None):
    B, Nq, C = q.shape
    Nk = k.shape[1]
    assert C % num_heads == 0, "dim must be divisible by num_heads"
    scale = (C // num_heads) ** -0.5
    Bb = _pick_batch_block(B, max(Nq, Nk))
    q_spec = pl.BlockSpec((Bb, Nq, C), lambda i: (i, 0, 0))
    kv_spec = pl.BlockSpec((Bb, Nk, C), lambda i: (i, 0, 0))
    cvec = pl.BlockSpec((1, C), lambda i: (0, 0))
    wmat = pl.BlockSpec((C, C), lambda i: (0, 0))
    return pl.pallas_call(
        functools.partial(_cross_attn_block_kernel, num_heads=num_heads, scale=scale, eps=eps),
        out_shape=jax.ShapeDtypeStruct((B, Nq, C), q.dtype),
        grid=(B // Bb,),
        in_specs=[q_spec, kv_spec, kv_spec, cvec, cvec, wmat, wmat, wmat, wmat, cvec, cvec],
        out_specs=q_spec,
        scratch_shapes=[pltpu.VMEM((Bb * Nq, C), jnp.float32)],
        compiler_params=pltpu.CompilerParams(
            dimension_semantics=("parallel",),
            vmem_limit_bytes=vmem_limit_bytes),
    )(q, k, v, ln_g, ln_b, wq, wk, wv, w_proj, b_proj, gamma)


# ----------------------------------------------------------------------------------------------
# Full QKVSABlock forward
# ----------------------------------------------------------------------------------------------

def qkvsa_block_forward(p, q, k, v, *, num_heads, vmem_limit_bytes=None):
    """q, k, v: [B, C, H, W] (NCHW, like the PyTorch module). Returns [B, C, H, W]."""
    B, C, H, W = q.shape
    assert C % num_heads == 0, "dim must be divisible by num_heads"
    N = H * W

    # NCHW -> token layout [B, N, C] (the module's flatten(2).transpose(1,2)); XLA transposes.
    q_nhwc = jnp.transpose(q, (0, 2, 3, 1))
    k_tok = jnp.transpose(k, (0, 2, 3, 1)).reshape(B, N, C)
    v_tok = jnp.transpose(v, (0, 2, 3, 1)).reshape(B, N, C)

    # q = q + pos_embed(q)   (depthwise 3x3 conv, padding=1, groups=dim)
    q_tok = pos_embed_conv(q_nhwc, p['pos_w'], p['pos_b'],
                           vmem_limit_bytes=vmem_limit_bytes).reshape(B, N, C)

    # encoder "pre" block
    q_tok = sa_block(q_tok, p['ln1p_g'], p['ln1p_b'], p['wqkv_p'], p['wproj_p'], p['bproj_p'],
                     p['g1p'], num_heads=num_heads, vmem_limit_bytes=vmem_limit_bytes)
    q_tok = mlp_block(q_tok, p['ln2p_g'], p['ln2p_b'], p['w1p'], p['b1p'], p['w2p'], p['b2p'],
                      p['g2p'], vmem_limit_bytes=vmem_limit_bytes)

    # decoder block (cross QKV attention + MLP)
    q_tok = qkv_cross_attn_block(q_tok, k_tok, v_tok, p['ln1_g'], p['ln1_b'],
                                 p['wq'], p['wk'], p['wv'], p['wproj'], p['bproj'], p['g1'],
                                 num_heads=num_heads, vmem_limit_bytes=vmem_limit_bytes)
    q_tok = mlp_block(q_tok, p['ln2_g'], p['ln2_b'], p['w1'], p['b1'], p['w2'], p['b2'],
                      p['g2'], vmem_limit_bytes=vmem_limit_bytes)

    # tokens -> NCHW
    return jnp.transpose(q_tok.reshape(B, H, W, C), (0, 3, 1, 2))


# ----------------------------------------------------------------------------------------------
# Pure-JAX reference mirroring the PyTorch forward
# ----------------------------------------------------------------------------------------------

def _layernorm_ref(x, g, b, eps=1e-5):
    mu = jnp.mean(x, axis=-1, keepdims=True)
    var = jnp.mean((x - mu) ** 2, axis=-1, keepdims=True)
    return (x - mu) / jnp.sqrt(var + eps) * g + b


def _mha_ref(qp, kp, vp, num_heads, scale):
    B, Nq, C = qp.shape
    Nk = kp.shape[1]
    D = C // num_heads
    qh = qp.reshape(B, Nq, num_heads, D).transpose(0, 2, 1, 3)
    kh = kp.reshape(B, Nk, num_heads, D).transpose(0, 2, 1, 3)
    vh = vp.reshape(B, Nk, num_heads, D).transpose(0, 2, 1, 3)
    attn = jnp.einsum('bhqd,bhkd->bhqk', qh, kh) * scale
    attn = jax.nn.softmax(attn, axis=-1)
    ctx = jnp.einsum('bhqk,bhkd->bhqd', attn, vh)
    return ctx.transpose(0, 2, 1, 3).reshape(B, Nq, C)


def qkvsa_block_ref(p, q, k, v, *, num_heads, eps=1e-5):
    with jax.default_matmul_precision("float32"):
        B, C, H, W = q.shape
        scale = (C // num_heads) ** -0.5
        N = H * W

        qn = jnp.transpose(q, (0, 2, 3, 1))
        qpad = jnp.pad(qn, ((0, 0), (1, 1), (1, 1), (0, 0)))
        conv = jnp.zeros_like(qn) + p['pos_b'].reshape(1, 1, 1, C)
        for dy in range(3):
            for dx in range(3):
                conv = conv + qpad[:, dy:dy + H, dx:dx + W, :] * p['pos_w'][dy * 3 + dx].reshape(1, 1, 1, C)
        qt = (qn + conv).reshape(B, N, C)
        kt = jnp.transpose(k, (0, 2, 3, 1)).reshape(B, N, C)
        vt = jnp.transpose(v, (0, 2, 3, 1)).reshape(B, N, C)

        # pre self-attention
        xn = _layernorm_ref(qt, p['ln1p_g'][0], p['ln1p_b'][0], eps)
        qkv = xn @ p['wqkv_p']
        att = _mha_ref(qkv[..., :C], qkv[..., C:2 * C], qkv[..., 2 * C:], num_heads, scale)
        qt = qt + p['g1p'][0] * (att @ p['wproj_p'] + p['bproj_p'][0])

        # pre mlp
        xn = _layernorm_ref(qt, p['ln2p_g'][0], p['ln2p_b'][0], eps)
        h = _gelu_tanh(xn @ p['w1p'] + p['b1p'][0])
        qt = qt + p['g2p'][0] * (h @ p['w2p'] + p['b2p'][0])

        # cross attention
        qn2 = _layernorm_ref(qt, p['ln1_g'][0], p['ln1_b'][0], eps)
        kn2 = _layernorm_ref(kt, p['ln1_g'][0], p['ln1_b'][0], eps)
        vn2 = _layernorm_ref(vt, p['ln1_g'][0], p['ln1_b'][0], eps)
        att = _mha_ref(qn2 @ p['wq'], kn2 @ p['wk'], vn2 @ p['wv'], num_heads, scale)
        qt = qt + p['g1'][0] * (att @ p['wproj'] + p['bproj'][0])

        # main mlp
        xn = _layernorm_ref(qt, p['ln2_g'][0], p['ln2_b'][0], eps)
        h = _gelu_tanh(xn @ p['w1'] + p['b1'][0])
        qt = qt + p['g2'][0] * (h @ p['w2'] + p['b2'][0])

        return jnp.transpose(qt.reshape(B, H, W, C), (0, 3, 1, 2))


# ----------------------------------------------------------------------------------------------
# Demo / self-test
# ----------------------------------------------------------------------------------------------

if __name__ == "__main__":
    B, C, H, W = 2, 32, 8, 8          # dim=32, num_heads=8 (head_dim=4), 8x8 spatial -> N=64 tokens
    num_heads = 8
    hidden = 4 * C                    # mlp_ratio = 4.0

    key = jax.random.PRNGKey(0)
    keys = iter(jax.random.split(key, 32))

    def nrm(shape, std):
        return jax.random.normal(next(keys), shape, dtype=jnp.float32) * std

    gamma = jnp.full((1, C), 0.5, jnp.float32)   # gamma_* are free parameters; 0.5 exercises the branches
    params = {
        # pos_embed: depthwise 3x3 conv taps (dy*3+dx, C) + bias
        'pos_w': nrm((9, C), 0.3), 'pos_b': nrm((1, C), 0.05),
        # encoder pre-attention: fused qkv (no bias), proj (bias)
        'ln1p_g': 1.0 + nrm((1, C), 0.05), 'ln1p_b': nrm((1, C), 0.05),
        'wqkv_p': nrm((C, 3 * C), C ** -0.5),
        'wproj_p': nrm((C, C), C ** -0.5), 'bproj_p': nrm((1, C), 0.05),
        'g1p': gamma,
        # encoder pre-mlp
        'ln2p_g': 1.0 + nrm((1, C), 0.05), 'ln2p_b': nrm((1, C), 0.05),
        'w1p': nrm((C, hidden), C ** -0.5), 'b1p': nrm((1, hidden), 0.05),
        'w2p': nrm((hidden, C), hidden ** -0.5), 'b2p': nrm((1, C), 0.05),
        'g2p': gamma,
        # decoder cross attention: separate wq/wk/wv (no bias), proj (bias)
        'ln1_g': 1.0 + nrm((1, C), 0.05), 'ln1_b': nrm((1, C), 0.05),
        'wq': nrm((C, C), C ** -0.5), 'wk': nrm((C, C), C ** -0.5), 'wv': nrm((C, C), C ** -0.5),
        'wproj': nrm((C, C), C ** -0.5), 'bproj': nrm((1, C), 0.05),
        'g1': gamma,
        # decoder mlp
        'ln2_g': 1.0 + nrm((1, C), 0.05), 'ln2_b': nrm((1, C), 0.05),
        'w1': nrm((C, hidden), C ** -0.5), 'b1': nrm((1, hidden), 0.05),
        'w2': nrm((hidden, C), hidden ** -0.5), 'b2': nrm((1, C), 0.05),
        'g2': gamma,
    }

    q = jax.random.normal(next(keys), (B, C, H, W), dtype=jnp.float32)
    k = jax.random.normal(next(keys), (B, C, H, W), dtype=jnp.float32)
    v = jax.random.normal(next(keys), (B, C, H, W), dtype=jnp.float32)

    out = qkvsa_block_forward(params, q, k, v, num_heads=num_heads)
    out = jax.block_until_ready(out)

    ref = qkvsa_block_ref(params, q, k, v, num_heads=num_heads)
    assert out.shape == (B, C, H, W)
    max_err = float(jnp.max(jnp.abs(out - ref)))
    assert jnp.allclose(out, ref, atol=5e-3, rtol=5e-3), f"mismatch vs reference, max|err|={max_err}"

    print("KERNEL_OK")
</pallas_src>

<mosaic_0001>
module attributes {stable_mosaic.version = 11 : i64} {
  func.func @_pos_embed_kernel(%arg0: i32, %arg1: memref<1x10x10x32xf32, #tpu.memory_space<vmem>>, %arg2: memref<9x32xf32, #tpu.memory_space<vmem>>, %arg3: memref<1x32xf32, #tpu.memory_space<vmem>>, %arg4: memref<1x8x8x32xf32, #tpu.memory_space<vmem>>) attributes {dimension_semantics = [#tpu.dimension_semantics<parallel>], iteration_bounds = array<i64: 2>, scalar_prefetch = 0 : i64, scratch_operands = 0 : i64, tpu.core_type = #tpu.core_type<tc>, window_params = [{transform_indices = @transform_0, window_bounds = array<i64: 1, 10, 10, 32>}, {pipeline_mode = #tpu.pipeline_mode<synchronous>, transform_indices = @transform_1, window_bounds = array<i64: 9, 32>}, {pipeline_mode = #tpu.pipeline_mode<synchronous>, transform_indices = @transform_2, window_bounds = array<i64: 1, 32>}, {transform_indices = @transform_3, window_bounds = array<i64: 1, 8, 8, 32>}]} {
    %c0 = arith.constant 0 : index
    %c1 = arith.constant 1 : index
    %c1_0 = arith.constant 1 : index
    %c0_1 = arith.constant 0 : index
    %0 = vector.load %arg1[%c0, %c1, %c1_0, %c0_1] : memref<1x10x10x32xf32, #tpu.memory_space<vmem>>, vector<1x8x8x32xf32>
    %1 = vector.shape_cast %0 : vector<1x8x8x32xf32> to vector<8x8x32xf32>
    %c0_2 = arith.constant 0 : index
    %c0_3 = arith.constant 0 : index
    %2 = vector.load %arg3[%c0_2, %c0_3] : memref<1x32xf32, #tpu.memory_space<vmem>>, vector<1x32xf32>
    %3 = vector.shape_cast %2 : vector<1x32xf32> to vector<1x1x32xf32>
    %4 = vector.broadcast %3 : vector<1x1x32xf32> to vector<8x8x32xf32>
    %5 = arith.addf %1, %4 : vector<8x8x32xf32>
    %c0_4 = arith.constant 0 : index
    %c0_5 = arith.constant 0 : index
    %6 = vector.load %arg2[%c0_4, %c0_5] : memref<9x32xf32, #tpu.memory_space<vmem>>, vector<1x32xf32>
    %7 = vector.shape_cast %6 : vector<1x32xf32> to vector<1x1x32xf32>
    %c0_6 = arith.constant 0 : index
    %c0_7 = arith.constant 0 : index
    %c0_8 = arith.constant 0 : index
    %c0_9 = arith.constant 0 : index
    %8 = vector.load %arg1[%c0_6, %c0_7, %c0_8, %c0_9] : memref<1x10x10x32xf32, #tpu.memory_space<vmem>>, vector<1x8x8x32xf32>
    %9 = vector.shape_cast %8 : vector<1x8x8x32xf32> to vector<8x8x32xf32>
    %10 = vector.broadcast %7 : vector<1x1x32xf32> to vector<8x8x32xf32>
    %11 = arith.mulf %9, %10 : vector<8x8x32xf32>
    %12 = arith.addf %5, %11 : vector<8x8x32xf32>
    %c1_10 = arith.constant 1 : index
    %c0_11 = arith.constant 0 : index
    %13 = vector.load %arg2[%c1_10, %c0_11] : memref<9x32xf32, #tpu.memory_space<vmem>>, vector<1x32xf32>
    %14 = vector.shape_cast %13 : vector<1x32xf32> to vector<1x1x32xf32>
    %c0_12 = arith.constant 0 : index
    %c0_13 = arith.constant 0 : index
    %c1_14 = arith.constant 1 : index
    %c0_15 = arith.constant 0 : index
    %15 = vector.load %arg1[%c0_12, %c0_13, %c1_14, %c0_15] : memref<1x10x10x32xf32, #tpu.memory_space<vmem>>, vector<1x8x8x32xf32>
    %16 = vector.shape_cast %15 : vector<1x8x8x32xf32> to vector<8x8x32xf32>
    %17 = vector.broadcast %14 : vector<1x1x32xf32> to vector<8x8x32xf32>
    %18 = arith.mulf %16, %17 : vector<8x8x32xf32>
    %19 = arith.addf %12, %18 : vector<8x8x32xf32>
    %c2 = arith.constant 2 : index
    %c0_16 = arith.constant 0 : index
    %20 = vector.load %arg2[%c2, %c0_16] : memref<9x32xf32, #tpu.memory_space<vmem>>, vector<1x32xf32>
    %21 = vector.shape_cast %20 : vector<1x32xf32> to vector<1x1x32xf32>
    %c0_17 = arith.constant 0 : index
    %c0_18 = arith.constant 0 : index
    %c2_19 = arith.constant 2 : index
    %c0_20 = arith.constant 0 : index
    %22 = vector.load %arg1[%c0_17, %c0_18, %c2_19, %c0_20] : memref<1x10x10x32xf32, #tpu.memory_space<vmem>>, vector<1x8x8x32xf32>
    %23 = vector.shape_cast %22 : vector<1x8x8x32xf32> to vector<8x8x32xf32>
    %24 = vector.broadcast %21 : vector<1x1x32xf32> to vector<8x8x32xf32>
    %25 = arith.mulf %23, %24 : vector<8x8x32xf32>
    %26 = arith.addf %19, %25 : vector<8x8x32xf32>
    %c3 = arith.constant 3 : index
    %c0_21 = arith.constant 0 : index
    %27 = vector.load %arg2[%c3, %c0_21] : memref<9x32xf32, #tpu.memory_space<vmem>>, vector<1x32xf32>
    %28 = vector.shape_cast %27 : vector<1x32xf32> to vector<1x1x32xf32>
    %c0_22 = arith.constant 0 : index
    %c1_23 = arith.constant 1 : index
    %c0_24 = arith.constant 0 : index
    %c0_25 = arith.constant 0 : index
    %29 = vector.load %arg1[%c0_22, %c1_23, %c0_24, %c0_25] : memref<1x10x10x32xf32, #tpu.memory_space<vmem>>, vector<1x8x8x32xf32>
    %30 = vector.shape_cast %29 : vector<1x8x8x32xf32> to vector<8x8x32xf32>
    %31 = vector.broadcast %28 : vector<1x1x32xf32> to vector<8x8x32xf32>
    %32 = arith.mulf %30, %31 : vector<8x8x32xf32>
    %33 = arith.addf %26, %32 : vector<8x8x32xf32>
    %c4 = arith.constant 4 : index
    %c0_26 = arith.constant 0 : index
    %34 = vector.load %arg2[%c4, %c0_26] : memref<9x32xf32, #tpu.memory_space<vmem>>, vector<1x32xf32>
    %35 = vector.shape_cast %34 : vector<1x32xf32> to vector<1x1x32xf32>
    %c0_27 = arith.constant 0 : index
    %c1_28 = arith.constant 1 : index
    %c1_29 = arith.constant 1 : index
    %c0_30 = arith.constant 0 : index
    %36 = vector.load %arg1[%c0_27, %c1_28, %c1_29, %c0_30] : memref<1x10x10x32xf32, #tpu.memory_space<vmem>>, vector<1x8x8x32xf32>
    %37 = vector.shape_cast %36 : vector<1x8x8x32xf32> to vector<8x8x32xf32>
    %38 = vector.broadcast %35 : vector<1x1x32xf32> to vector<8x8x32xf32>
    %39 = arith.mulf %37, %38 : vector<8x8x32xf32>
    %40 = arith.addf %33, %39 : vector<8x8x32xf32>
    %c5 = arith.constant 5 : index
    %c0_31 = arith.constant 0 : index
    %41 = vector.load %arg2[%c5, %c0_31] : memref<9x32xf32, #tpu.memory_space<vmem>>, vector<1x32xf32>
    %42 = vector.shape_cast %41 : vector<1x32xf32> to vector<1x1x32xf32>
    %c0_32 = arith.constant 0 : index
    %c1_33 = arith.constant 1 : index
    %c2_34 = arith.constant 2 : index
    %c0_35 = arith.constant 0 : index
    %43 = vector.load %arg1[%c0_32, %c1_33, %c2_34, %c0_35] : memref<1x10x10x32xf32, #tpu.memory_space<vmem>>, vector<1x8x8x32xf32>
    %44 = vector.shape_cast %43 : vector<1x8x8x32xf32> to vector<8x8x32xf32>
    %45 = vector.broadcast %42 : vector<1x1x32xf32> to vector<8x8x32xf32>
    %46 = arith.mulf %44, %45 : vector<8x8x32xf32>
    %47 = arith.addf %40, %46 : vector<8x8x32xf32>
    %c6 = arith.constant 6 : index
    %c0_36 = arith.constant 0 : index
    %48 = vector.load %arg2[%c6, %c0_36] : memref<9x32xf32, #tpu.memory_space<vmem>>, vector<1x32xf32>
    %49 = vector.shape_cast %48 : vector<1x32xf32> to vector<1x1x32xf32>
    %c0_37 = arith.constant 0 : index
    %c2_38 = arith.constant 2 : index
    %c0_39 = arith.constant 0 : index
    %c0_40 = arith.constant 0 : index
    %50 = vector.load %arg1[%c0_37, %c2_38, %c0_39, %c0_40] : memref<1x10x10x32xf32, #tpu.memory_space<vmem>>, vector<1x8x8x32xf32>
    %51 = vector.shape_cast %50 : vector<1x8x8x32xf32> to vector<8x8x32xf32>
    %52 = vector.broadcast %49 : vector<1x1x32xf32> to vector<8x8x32xf32>
    %53 = arith.mulf %51, %52 : vector<8x8x32xf32>
    %54 = arith.addf %47, %53 : vector<8x8x32xf32>
    %c7 = arith.constant 7 : index
    %c0_41 = arith.constant 0 : index
    %55 = vector.load %arg2[%c7, %c0_41] : memref<9x32xf32, #tpu.memory_space<vmem>>, vector<1x32xf32>
    %56 = vector.shape_cast %55 : vector<1x32xf32> to vector<1x1x32xf32>
    %c0_42 = arith.constant 0 : index
    %c2_43 = arith.constant 2 : index
    %c1_44 = arith.constant 1 : index
    %c0_45 = arith.constant 0 : index
    %57 = vector.load %arg1[%c0_42, %c2_43, %c1_44, %c0_45] : memref<1x10x10x32xf32, #tpu.memory_space<vmem>>, vector<1x8x8x32xf32>
    %58 = vector.shape_cast %57 : vector<1x8x8x32xf32> to vector<8x8x32xf32>
    %59 = vector.broadcast %56 : vector<1x1x32xf32> to vector<8x8x32xf32>
    %60 = arith.mulf %58, %59 : vector<8x8x32xf32>
    %61 = arith.addf %54, %60 : vector<8x8x32xf32>
    %c8 = arith.constant 8 : index
    %c0_46 = arith.constant 0 : index
    %62 = vector.load %arg2[%c8, %c0_46] : memref<9x32xf32, #tpu.memory_space<vmem>>, vector<1x32xf32>
    %63 = vector.shape_cast %62 : vector<1x32xf32> to vector<1x1x32xf32>
    %c0_47 = arith.constant 0 : index
    %c2_48 = arith.constant 2 : index
    %c2_49 = arith.constant 2 : index
    %c0_50 = arith.constant 0 : index
    %64 = vector.load %arg1[%c0_47, %c2_48, %c2_49, %c0_50] : memref<1x10x10x32xf32, #tpu.memory_space<vmem>>, vector<1x8x8x32xf32>
    %65 = vector.shape_cast %64 : vector<1x8x8x32xf32> to vector<8x8x32xf32>
    %66 = vector.broadcast %63 : vector<1x1x32xf32> to vector<8x8x32xf32>
    %67 = arith.mulf %65, %66 : vector<8x8x32xf32>
    %68 = arith.addf %61, %67 : vector<8x8x32xf32>
    %c0_51 = arith.constant 0 : index
    %c0_52 = arith.constant 0 : index
    %c0_53 = arith.constant 0 : index
    %c0_54 = arith.constant 0 : index
    %69 = vector.load %arg4[%c0_51, %c0_52, %c0_53, %c0_54] : memref<1x8x8x32xf32, #tpu.memory_space<vmem>>, vector<1x8x8x32xf32>
    %70 = vector.shape_cast %69 : vector<1x8x8x32xf32> to vector<8x8x32xf32>
    %71 = vector.shape_cast %68 : vector<8x8x32xf32> to vector<1x8x8x32xf32>
    tpu.vector_store %arg4[%c0_51, %c0_52, %c0_53, %c0_54], %71 {strides = array<i32>} : memref<1x8x8x32xf32, #tpu.memory_space<vmem>>, vector<1x8x8x32xf32>,
    return
  }
  func.func @transform_0(%arg0: i32) -> (i32, i32, i32, i32) {
    %c0_i32 = arith.constant 0 : i32
    %c0_i32_0 = arith.constant 0 : i32
    %c0_i32_1 = arith.constant 0 : i32
    %c0_i32_2 = arith.constant 0 : i32
    return %arg0, %c0_i32, %c0_i32_0, %c0_i32_1 : i32, i32, i32, i32
  }
  func.func @transform_1(%arg0: i32) -> (i32, i32) {
    %c0_i32 = arith.constant 0 : i32
    %c0_i32_0 = arith.constant 0 : i32
    %c0_i32_1 = arith.constant 0 : i32
    return %c0_i32, %c0_i32_0 : i32, i32
  }
  func.func @transform_2(%arg0: i32) -> (i32, i32) {
    %c0_i32 = arith.constant 0 : i32
    %c0_i32_0 = arith.constant 0 : i32
    %c0_i32_1 = arith.constant 0 : i32
    return %c0_i32, %c0_i32_0 : i32, i32
  }
  func.func @transform_3(%arg0: i32) -> (i32, i32, i32, i32) {
    %c0_i32 = arith.constant 0 : i32
    %c0_i32_0 = arith.constant 0 : i32
    %c0_i32_1 = arith.constant 0 : i32
    %c0_i32_2 = arith.constant 0 : i32
    return %arg0, %c0_i32, %c0_i32_0, %c0_i32_1 : i32, i32, i32, i32
  }
}

</mosaic_0001>

<bundles_post_ra>
// kernel: tpu_custom_call.1
= control target key start
LH: loop header
LB: loop body
LE: loop exit
PB: predicated region body
PF: predicated region fallthrough
CT: control target
= control target key end

     0   :  { %8 = vsyncpa [#allocation3], 0  ;;  %s1019_s0 = inlined_call_operand.vmem [shape: f32[2,10,10,32], index: 0, kind: input, shape index: {}]   ;;  %s1020_s1 = inlined_call_operand.vmem [shape: f32[9,32], index: 1, kind: input, shape index: {}]   ;;  %s1021_s2 = inlined_call_operand.vmem [shape: f32[1,32], index: 2, kind: input, shape index: {}]   ;;  %s1022_s3 = inlined_call_operand.hbm [shape: f32[2,8,8,32], index: 3, kind: output, shape index: {}]  }
   0x1   :  { %10 = vsyncpa [#allocation3 + $0x1], 0  ;;  %s729_s12 = smov 0   ;;  %s731_s13 = smov 0  }
   0x2   :  { %s733_s14 = smov 0   ;;  %s735_s15 = smov 0  }
   0x3 LB: > { %s750_s16 = sadd.s32 4294967295, %s704_s15   ;;  %s532_s17 = sadd.s32 4294967294, %s704_s15   ;;  %s704_s15 = sphi %s735_s15, %s1028_s15   ;;  %s700_s14 = sphi %s733_s14, %s1027_s14   ;;  %s696_s13 = sphi %s731_s13, %s1026_s13   ;;  %s692_s12 = sphi %s729_s12, %s1025_s12  }
   0x4   : > { %s754_s18 = sadd.s32 1, %s704_s15   ;;  %s91_s19 = sadd.s32 1, %s700_s14 }
   0x5   : > { %s88_s20 = ssub.s32 %s704_s15, %s754_s18  ;;  %p101_p0 = scmp.ne.s32.totalorder %s700_s14, %s696_s13 }
   0x6   : > { %p89_p1 = scmp.eq.s32.totalorder %s88_s20, 0  ;;  %p102_p2 = scmp.eq.s32.totalorder %s750_s16, 1 }
   0x7   : > { %p107_p3 = scmp.ne.s32.totalorder %s696_s13, %s692_s12  ;;  %p108_p4 = scmp.eq.s32.totalorder %s532_s17, 1 }
   0x8   : > { %s765_s21 = scalar_select %p89_p1, %s700_s14, %s91_s19  }
   0x9   : > { %p767_p5 = por %p102_p2, %p101_p0  ;;  %p771_p6 = por %p108_p4, %p107_p3 }
   0xa   : > { %p535_p7 = scmp.ge.s32.totalorder %s704_s15, 1  ;;  %p140_p8 = scmp.lt.s32.totalorder %s704_s15, 3 }
   0xc   : > { %p141_p9 = pnand %p535_p7, %p140_p8 }
   0xd   : > { %p164_p10 = scmp.lt.s32.totalorder (!%p141_p9), %s750_s16, 1  ;;  %s161_s4 = sand.u32 (!%p141_p9), 1, %s696_s13  }
   0xe   : > { %144 = sbr.rel (%p141_p9) target bundleno = 87 (0x57), region = 32  ;;  %s536_s5 = sshll.u32 (!%p141_p9), %s161_s4, 6 }
   0xf   : > { %s904_s6 = scalar_lea.vmem (!%p141_p9), [#allocation2], %s536_s5  ;;  %s601_s8 = sshll.u32 (!%p141_p9), %s750_s16, 10 }
  0x10   : > { %s470_s7 = sshll.u32 (!%p141_p9), %s904_s6, 4  ;;  %s979_s17 = scalar_lea.sflag (!%p141_p9), [#allocation3], %s161_s4  ;;  %s968_s7 = int_to_ptr.vmem [resolvable:$true] %s470_s7 }
  0x11   : > { %s706_s19 = smov (!%p141_p9), [#allocation2]  }
  0x12   : > { %s648_s20 = sshll.u32 (!%p141_p9), %s706_s19, 4  ;;  %s649_s20 = int_to_ptr.vmem [resolvable:$false] %s648_s20 }
  0x13   : > { %s165_s24 = scalar_select %p164_p10, %s750_s16, 1  ;;  %v782_v0 = vld [vmem:[%s1021_s2] ss:$0 sm:$0xff]  ;;  %v792_v2 = vld [vmem:[%s1020_s1 + $0x1] ss:$0 sm:$0xff]  ;;  %vm447_vm0 = vcmask 261120  }
  0x14   : > { %v787_v1 = vld [vmem:[%s1020_s1] ss:$0 sm:$0xff]  ;;  %v797_v3 = vld [vmem:[%s1020_s1 + $0x2] ss:$0 sm:$0xff]  ;;  %v807_v4 = vld [vmem:[%s1020_s1 + $0x3] ss:$0 sm:$0xff]  ;;  %p651_p0 = scmp.lt.s32.totalorder %s968_s7, %s649_s20 }
  0x15   : > { %s602_s25 = smul.u32 160, %s165_s24  ;;  %v812_v5 = vld [vmem:[%s1020_s1 + $0x4] ss:$0 sm:$0xff]  ;;  %v817_v6 = vld [vmem:[%s1020_s1 + $0x5] ss:$0 sm:$0xff]  ;;  %s644_s16 = scalar_lea.vmem %s968_s7, 1024 }
  0x16   : > { %v830_v15 = vld [vmem:[%s1020_s1 + $0x6] ss:$0 sm:$0xff]  ;;  %v835_v16 = vld [vmem:[%s1020_s1 + $0x7] ss:$0 sm:$0xff]  ;;  %v841_v18 = vld [vmem:[%s1020_s1 + $0x8] ss:$0 sm:$0xff]  ;;  %p645_p11 = scmp.ne.s32.totalorder %s968_s7, %s644_s16 }
  0x17   : > { %s802_s9 = scalar_lea.vmem %s1019_s0, %s602_s25  ;;  %s650_s24 = scalar_lea.vmem %s649_s20, 2048 }
  0x18   : > { %v538_v7 = vld [vmem:[%s802_s9 + $0x11] sm:$0xff]  ;;  %v194_v8 = vld [vmem:[%s802_s9] sm:$0xff]  ;;  %p646_p12 = pnand %p645_p11, %p767_p5  ;;  %p652_p1 = scmp.lt.s32.totalorder %s650_s24, %s644_s16 }
  0x19   : > { %v223_v9 = vld [vmem:[%s802_s9 + $0x1] sm:$0xff]  ;;  %v185_v10 = vadd.f32 %v782_v0, %v538_v7  ;;  %v206_v11 = vmul.f32 %v787_v1, %v194_v8  ;;  %v550_v14 = vld [vmem:[%s802_s9 + $0x10] sm:$0xff]  ;;  %v314_v22 = vmul.f32 %v812_v5, %v538_v7  ;;  %v236_v30 = vmul.f32 %v792_v2, %v538_v7 }
  0x1a   : > { %v235_v12 = vmul.f32 %v792_v2, %v223_v9  ;;  %v252_v13 = vld [vmem:[%s802_s9 + $0x2] sm:$0xff]  ;;  %v207_v19 = vmul.f32 %v550_v14, %v787_v1  ;;  %v560_v23 = vld [vmem:[%s802_s9 + $0x12] sm:$0xff]  ;;  %v293_v25 = vmul.f32 %v807_v4, %v550_v14  ;;  %p647_p13 = pneg %p646_p12  ;;  %p653_p2 = por %p652_p1, %p651_p0 }
  0x1b   : > { %v578_v17 = vld [vmem:[%s802_s9 + $0x21] sm:$0xff]  ;;  %v214_v20 = vadd.f32 %v206_v11, %v185_v10  ;;  %v264_v21 = vmul.f32 %v797_v3, %v252_v13  ;;  %v579_v24 = vld [vmem:[%s802_s9 + $0x31] sm:$0xff]  ;;  %v343_v26 = vmul.f32 %v817_v6, %v560_v23  ;;  %v265_v36 = vmul.f32 %v560_v23, %v797_v3 }
  0x1c   : > { %v569_v27 = vld [vmem:[%s802_s9 + $0x20] sm:$0xff]  ;;  %v186_v29 = vadd.f32 %v578_v17, %v782_v0  ;;  %v402_v33 = vmul.f32 %v835_v16, %v578_v17  ;;  %v187_v38 = vadd.f32 %v579_v24, %v782_v0  ;;  %v315_v40 = vmul.f32 %v578_v17, %v812_v5  ;;  %v570_v41 = vld [vmem:[%s802_s9 + $0x30] sm:$0xff]  ;;  %p654_p3 = pnand %p653_p2, %p647_p13 }
  0x1d   : > { %v587_v28 = vld [vmem:[%s802_s9 + $0x22] sm:$0xff]  ;;  %v243_v31 = vadd.f32 %v235_v12, %v214_v20  ;;  %v373_v32 = vmul.f32 %v830_v15, %v569_v27  ;;  %v294_v37 = vmul.f32 %v569_v27, %v807_v4  ;;  %v208_v42 = vmul.f32 %v569_v27, %v787_v1  ;;  %v588_v49 = vld [vmem:[%s802_s9 + $0x32] sm:$0xff] }
  0x1e   : > { %v857_v34 = vmul.f32 %v841_v18, %v587_v28  ;;  %v215_v35 = vadd.f32 %v207_v19, %v186_v29  ;;  %v237_v43 = vmul.f32 %v578_v17, %v792_v2  ;;  %v580_v44 = vld [vmem:[%s802_s9 + $0x41] sm:$0xff]  ;;  %v344_v46 = vmul.f32 %v587_v28, %v817_v6  ;;  %v581_v10 = vld [vmem:[%s802_s9 + $0x51] sm:$0xff] }
  0x1f   : > { %v272_v39 = vadd.f32 %v264_v21, %v243_v31  ;;  %v374_v47 = vmul.f32 %v830_v15, %v570_v41  ;;  %v403_v48 = vmul.f32 %v835_v16, %v579_v24  ;;  %v432_v51 = vmul.f32 %v841_v18, %v588_v49  ;;  %v571_v7 = vld [vmem:[%s802_s9 + $0x40] sm:$0xff] }
  0x20   : > { %v244_v45 = vadd.f32 %v236_v30, %v215_v35  ;;  %v216_v52 = vadd.f32 %v208_v42, %v187_v38  ;;  %v266_v53 = vmul.f32 %v587_v28, %v797_v3  ;;  %v295_v55 = vmul.f32 %v570_v41, %v807_v4  ;;  %v589_v17 = vld [vmem:[%s802_s9 + $0x42] sm:$0xff] }
  0x21   : > { %v301_v50 = vadd.f32 %v293_v25, %v272_v39  ;;  %v188_v56 = vadd.f32 %v580_v44, %v782_v0  ;;  %v209_v57 = vmul.f32 %v570_v41, %v787_v1  ;;  %v316_v60 = vmul.f32 %v579_v24, %v812_v5  ;;  %v582_v42 = vld [vmem:[%s802_s9 + $0x61] sm:$0xff] }
  0x22   : > { %v273_v54 = vadd.f32 %v265_v36, %v244_v45  ;;  %v245_v59 = vadd.f32 %v237_v43, %v216_v52  ;;  %v238_v61 = vmul.f32 %v579_v24, %v792_v2  ;;  %v345_v63 = vmul.f32 %v588_v49, %v817_v6  ;;  %v572_v36 = vld [vmem:[%s802_s9 + $0x50] sm:$0xff] }
  0x23   : > { %v322_v58 = vadd.f32 %v314_v22, %v301_v50  ;;  %v217_v8 = vadd.f32 %v209_v57, %v188_v56  ;;  %v267_v9 = vmul.f32 %v588_v49, %v797_v3  ;;  %v375_v13 = vmul.f32 %v830_v15, %v571_v7  ;;  %v590_v52 = vld [vmem:[%s802_s9 + $0x52] sm:$0xff] }
  0x24   : > { %v302_v62 = vadd.f32 %v294_v37, %v273_v54  ;;  %v274_v12 = vadd.f32 %v266_v53, %v245_v59  ;;  %v404_v14 = vmul.f32 %v835_v16, %v580_v44  ;;  %v433_v20 = vmul.f32 %v841_v18, %v589_v17 }
  0x25   : > { %v351_v11 = vadd.f32 %v343_v26, %v322_v58  ;;  %v246_v21 = vadd.f32 %v238_v61, %v217_v8  ;;  %v296_v22 = vmul.f32 %v571_v7, %v807_v4  ;;  %v189_v25 = vadd.f32 %v581_v10, %v782_v0  ;;  %v573_v61 = vld [vmem:[%s802_s9 + $0x60] sm:$0xff] }
  0x26   : > { %v323_v19 = vadd.f32 %v315_v40, %v302_v62  ;;  %v303_v24 = vadd.f32 %v295_v55, %v274_v12  ;;  %v210_v26 = vmul.f32 %v571_v7, %v787_v1  ;;  %v317_v29 = vmul.f32 %v580_v44, %v812_v5  ;;  %v583_v7 = vld [vmem:[%s802_s9 + $0x71] sm:$0xff] }
  0x27   : > { %v381_v23 = vadd.f32 %v373_v32, %v351_v11  ;;  %v275_v28 = vadd.f32 %v267_v9, %v246_v21  ;;  %v239_v30 = vmul.f32 %v580_v44, %v792_v2  ;;  %v268_v38 = vmul.f32 %v589_v17, %v797_v3 }
  0x28   : > { %v352_v27 = vadd.f32 %v344_v46, %v323_v19  ;;  %v324_v35 = vadd.f32 %v316_v60, %v303_v24  ;;  %v218_v37 = vadd.f32 %v210_v26, %v189_v25  ;;  %v346_v40 = vmul.f32 %v589_v17, %v817_v6  ;;  %v584_v26 = vld [vmem:[%s802_s9 + $0x81] sm:$0xff] }
  0x29   : > { %v410_v31 = vadd.f32 %v402_v33, %v381_v23  ;;  %v304_v39 = vadd.f32 %v296_v22, %v275_v28  ;;  %v376_v41 = vmul.f32 %v830_v15, %v572_v36  ;;  %v297_v44 = vmul.f32 %v572_v36, %v807_v4  ;;  %v574_v28 = vld [vmem:[%s802_s9 + $0x70] sm:$0xff] }
  0x2a   : > { %v382_v32 = vadd.f32 %v374_v47, %v352_v27  ;;  %v353_v45 = vadd.f32 %v345_v63, %v324_v35  ;;  %v247_v46 = vadd.f32 %v239_v30, %v218_v37  ;;  %v405_v50 = vmul.f32 %v835_v16, %v581_v10 }
  0x2b   : > { %v439_v43 = vadd.f32 %v857_v34, %v410_v31  ;;  %v325_v49 = vadd.f32 %v317_v29, %v304_v39  ;;  %v318_v47 = vmul.f32 %v581_v10, %v812_v5  ;;  %v190_v54 = vadd.f32 %v582_v42, %v782_v0 }
  0x2c   : > { %v411_v33 = vadd.f32 %v403_v48, %v382_v32  ;;  %v383_v34 = vadd.f32 %v375_v13, %v353_v45  ;;  %v276_v53 = vadd.f32 %v268_v38, %v247_v46  ;;  %v211_v48 = vmul.f32 %v572_v36, %v787_v1  ;;  %v592_v32 = vld [vmem:[%s802_s9 + $0x72] sm:$0xff] }
  0x2d   : > { %448 = vst.msk [vmem:[%s904_s6] sm:$0xff] %vm447_vm0, %v439_v43  ;;  %v354_v56 = vadd.f32 %v346_v40, %v325_v49  ;;  %v347_v57 = vmul.f32 %v590_v52, %v817_v6  ;;  %v240_v58 = vmul.f32 %v581_v10, %v792_v2  ;;  %v269_v63 = vmul.f32 %v590_v52, %v797_v3  ;;  %v591_v10 = vld [vmem:[%s802_s9 + $0x62] sm:$0xff] }
  0x2e   : > { %v440_v55 = vadd.f32 %v432_v51, %v411_v33  ;;  %v412_v59 = vadd.f32 %v404_v14, %v383_v34  ;;  %v305_v60 = vadd.f32 %v297_v44, %v276_v53  ;;  %v219_v62 = vadd.f32 %v211_v48, %v190_v54 }
  0x2f   : > { %v384_v8 = vadd.f32 %v376_v41, %v354_v56  ;;  %v434_v9 = vmul.f32 %v841_v18, %v590_v52  ;;  %v377_v51 = vmul.f32 %v830_v15, %v573_v61  ;;  %v298_v14 = vmul.f32 %v573_v61, %v807_v4 }
  0x30   : > { %449 = vst.msk [vmem:[%s904_s6 + $0x8] sm:$0xff] %vm447_vm0, %v440_v55  ;;  %v441_v11 = vadd.f32 %v433_v20, %v412_v59  ;;  %v326_v12 = vadd.f32 %v318_v47, %v305_v60  ;;  %v248_v13 = vadd.f32 %v240_v58, %v219_v62  ;;  %v406_v19 = vmul.f32 %v835_v16, %v582_v42  ;;  %v593_v58 = vld [vmem:[%s802_s9 + $0x82] sm:$0xff] }
  0x31   : > { %v413_v17 = vadd.f32 %v405_v50, %v384_v8  ;;  %v191_v21 = vadd.f32 %v583_v7, %v782_v0  ;;  %v212_v22 = vmul.f32 %v573_v61, %v787_v1  ;;  %v319_v20 = vmul.f32 %v582_v42, %v812_v5  ;;  %v575_v50 = vld [vmem:[%s802_s9 + $0x80] sm:$0xff] }
  0x32   : > { %450 = vst.msk [vmem:[%s904_s6 + $0x10] sm:$0xff] %vm447_vm0, %v441_v11  ;;  %v355_v23 = vadd.f32 %v347_v57, %v326_v12  ;;  %v277_v24 = vadd.f32 %v269_v63, %v248_v13  ;;  %v241_v25 = vmul.f32 %v582_v42, %v792_v2  ;;  %v270_v30 = vmul.f32 %v591_v10, %v797_v3  ;;  %v576_v63 = vld [vmem:[%s802_s9 + $0x90] sm:$0xff] }
  0x33   : > { %v442_v27 = vadd.f32 %v434_v9, %v413_v17  ;;  %v220_v29 = vadd.f32 %v212_v22, %v191_v21  ;;  %v435_v35 = vmul.f32 %v841_v18, %v591_v10  ;;  %v348_v37 = vmul.f32 %v591_v10, %v817_v6  ;;  %v585_v11 = vld [vmem:[%s802_s9 + $0x91] sm:$0xff] }
  0x34   : > { %v385_v31 = vadd.f32 %v377_v51, %v355_v23  ;;  %v306_v36 = vadd.f32 %v298_v14, %v277_v24  ;;  %v378_v38 = vmul.f32 %v830_v15, %v574_v28  ;;  %v299_v40 = vmul.f32 %v574_v28, %v807_v4  ;;  %v594_v13 = vld [vmem:[%s802_s9 + $0x92] sm:$0xff]  ;;  %s973_s9 = scalar_lea.hbm %s1022_s3, %s601_s8 }
  0x35   : > { %451 = vst.msk [vmem:[%s904_s6 + $0x18] sm:$0xff] %vm447_vm0, %v442_v27  ;;  %v249_v39 = vadd.f32 %v241_v25, %v220_v29  ;;  %v192_v41 = vadd.f32 %v584_v26, %v782_v0  ;;  %v213_v45 = vmul.f32 %v574_v28, %v787_v1  ;;  %v242_v46 = vmul.f32 %v583_v7, %v792_v2 }
  0x36   : > { %v414_v42 = vadd.f32 %v406_v19, %v385_v31  ;;  %v327_v43 = vadd.f32 %v319_v20, %v306_v36  ;;  %v407_v44 = vmul.f32 %v835_v16, %v583_v7  ;;  %v320_v49 = vmul.f32 %v583_v7, %v812_v5 }
  0x37   : > { %v278_v33 = vadd.f32 %v270_v30, %v249_v39  ;;  %v221_v34 = vadd.f32 %v213_v45, %v192_v41  ;;  %v271_v53 = vmul.f32 %v592_v32, %v797_v3  ;;  %v349_v54 = vmul.f32 %v592_v32, %v817_v6 }
  0x38   : > { %v443_v52 = vadd.f32 %v435_v35, %v414_v42  ;;  %v356_v47 = vadd.f32 %v348_v37, %v327_v43  ;;  %v436_v2 = vmul.f32 %v841_v18, %v592_v32  ;;  %v300_v55 = vmul.f32 %v575_v50, %v807_v4 }
  0x39   : > { %v307_v0 = vadd.f32 %v299_v40, %v278_v33  ;;  %v250_v48 = vadd.f32 %v242_v46, %v221_v34  ;;  %v379_v57 = vmul.f32 %v830_v15, %v575_v50  ;;  %v321_v60 = vmul.f32 %v584_v26, %v812_v5 }
  0x3a   : > { %452 = vst.msk [vmem:[%s904_s6 + $0x20] sm:$0xff] %vm447_vm0, %v443_v52  ;;  %v386_v1 = vadd.f32 %v378_v38, %v356_v47  ;;  %v408_v62 = vmul.f32 %v835_v16, %v584_v26  ;;  %v350_v4 = vmul.f32 %v593_v58, %v817_v6  ;;  %v437_v51 = vmul.f32 %v841_v18, %v593_v58 }
  0x3b   : > { %v328_v56 = vadd.f32 %v320_v49, %v307_v0  ;;  %v279_v3 = vadd.f32 %v271_v53, %v250_v48  ;;  %v380_v5 = vmul.f32 %v830_v15, %v576_v63  ;;  %v409_v17 = vmul.f32 %v835_v16, %v585_v11 }
  0x3c   : > { %v415_v59 = vadd.f32 %v407_v44, %v386_v1  ;;  %v438_v21 = vmul.f32 %v841_v18, %v594_v13 }
  0x3d   : > { %v357_v61 = vadd.f32 %v349_v54, %v328_v56  ;;  %v308_v8 = vadd.f32 %v300_v55, %v279_v3 }
  0x3e   : > { %v444_v7 = vadd.f32 %v436_v2, %v415_v59 }
  0x3f   : > { %v387_v9 = vadd.f32 %v379_v57, %v357_v61  ;;  %v329_v12 = vadd.f32 %v321_v60, %v308_v8 }
  0x40   : > { %453 = vst.msk [vmem:[%s904_s6 + $0x28] sm:$0xff] %vm447_vm0, %v444_v7 }
  0x41   : > { %v416_v10 = vadd.f32 %v408_v62, %v387_v9  ;;  %v358_v14 = vadd.f32 %v350_v4, %v329_v12 }
  0x43   : > { %v445_v19 = vadd.f32 %v437_v51, %v416_v10  ;;  %v388_v6 = vadd.f32 %v380_v5, %v358_v14 }
  0x45   : > { %454 = vst.msk [vmem:[%s904_s6 + $0x30] sm:$0xff] %vm447_vm0, %v445_v19  ;;  %v417_v22 = vadd.f32 %v409_v17, %v388_v6 }
  0x47   : > { %v446_v15 = vadd.f32 %v438_v21, %v417_v22 }
  0x49   : > { %455 = vst.msk [vmem:[%s904_s6 + $0x38] sm:$0xff] %vm447_vm0, %v446_v15 }
  0x4a   : > { %657 = shalt.err (!%p654_p3)
}
  0x4b   : > { %s658_s25 = scalar_lea.hbm %s973_s9, 1024  ;;  %s662_s28 = scalar_lea.hbm %s1022_s3, 2048 }
  0x4c   : > { %p659_p4 = scmp.ne.s32.totalorder %s973_s9, %s658_s25  ;;  %p663_p9 = scmp.lt.s32.totalorder %s973_s9, %s1022_s3 }
  0x4d   : > { %p664_p10 = scmp.lt.s32.totalorder %s662_s28, %s658_s25 }
  0x4e   : > { %p660_p7 = pnand %p659_p4, %p767_p5 }
  0x4f   : > { %p665_p11 = por %p664_p10, %p663_p9 }
  0x50   : > { %p661_p8 = pneg %p660_p7 }
  0x52   : > { %p666_p12 = pnand %p665_p11, %p661_p8 }
  0x54   : > { %669 = shalt.err (!%p666_p12)
}
  0x55   : > { %s707_s4 = smov 128   ;;  %s708_s5 = smov 8  }
  0x56   : > { %603 = dma.vmem_to_hbm [thread:$0]  (%p767_p5), %s968_s7, 1024, %s973_s9, %s979_s17, %s707_s4, %s707_s4, %s708_s5  }
  0x57 PF: > { %p609_p13 = scmp.ge.s32.totalorder %s704_s15, 2  ;;  %s485_s6 = sand.u32 1, %s692_s12  }
  0x58   : > { %s486_s8 = scalar_lea.sflag [#allocation3], %s485_s6 }
  0x59   : > { %p606_p0 = pnand %p609_p13, %p771_p6 }
  0x5b   : > { %p607_p1 = pneg %p606_p0 }
  0x5d   : > { %687 = dma.done.wait (%p607_p1), %s486_s8, 1024  }
  0x5e   : > { %689 = vsyncadd (%p607_p1), %s486_s8, 4294966272  ;;  %p13_p2 = scmp.ge.s32.totalorder %s754_s18, 4   ;;  %s1025_s12 = smov %s696_s13 }
  0x5f   : > { %s1026_s13 = smov %s700_s14  ;;  %s1027_s14 = smov %s765_s21 }
  0x60   : > { %s1028_s15 = smov %s754_s18  ;;  %15 = sbr.rel (!%p13_p2) target bundleno = 3 (0x3), region = 69 }
  0x65   :  { %491 = vsyncpa [#allocation3], 1 }
  0x66   :  { %493 = vsyncpa [#allocation3 + $0x1], 1 }

</bundles_post_ra>
